<compile_context>
chip_gen: v7x
topology: tpu7x:2x2x1
jax: 0.10.0
libtpu: 0.0.40
codegen_flags: <defaults>
</compile_context>

<pallas_src>
import functools

import numpy as np
import jax
import jax.numpy as jnp
from jax.experimental import pallas as pl
from jax.experimental.pallas import tpu as pltpu


# ----------------------------------------------------------------------------
# Constant-buffer construction (pure numpy, mirrors the PyTorch __init__)
# ----------------------------------------------------------------------------
def _build_C(F):
    ctrl_pts_x = np.linspace(-1.0, 1.0, int(F / 2))
    ctrl_pts_y_top = -1 * np.ones(int(F / 2))
    ctrl_pts_y_bottom = np.ones(int(F / 2))
    ctrl_pts_top = np.stack([ctrl_pts_x, ctrl_pts_y_top], axis=1)
    ctrl_pts_bottom = np.stack([ctrl_pts_x, ctrl_pts_y_bottom], axis=1)
    return np.concatenate([ctrl_pts_top, ctrl_pts_bottom], axis=0)


def _build_inv_delta_C(F, C):
    hat_C = np.zeros((F, F), dtype=float)
    for i in range(0, F):
        for j in range(i, F):
            r = np.linalg.norm(C[i] - C[j])
            hat_C[i, j] = r
            hat_C[j, i] = r
    np.fill_diagonal(hat_C, 1)
    hat_C = hat_C ** 2 * np.log(hat_C)
    delta_C = np.concatenate(
        [
            np.concatenate([np.ones((F, 1)), C, hat_C], axis=1),
            np.concatenate([np.zeros((2, 3)), np.transpose(C)], axis=1),
            np.concatenate([np.zeros((1, 3)), np.ones((1, F))], axis=1),
        ],
        axis=0,
    )
    return np.linalg.inv(delta_C)


def _build_P(I_r_width, I_r_height):
    I_r_grid_x = (np.arange(-I_r_width, I_r_width, 2) + 1.0) / I_r_width
    I_r_grid_y = (np.arange(-I_r_height, I_r_height, 2) + 1.0) / I_r_height
    P = np.stack(np.meshgrid(I_r_grid_x, I_r_grid_y), axis=2)
    return P.reshape([-1, 2])


def _build_P_hat(F, C, P, eps):
    n = P.shape[0]
    P_tile = np.tile(np.expand_dims(P, axis=1), (1, F, 1))
    C_tile = np.expand_dims(C, axis=0)
    P_diff = P_tile - C_tile
    rbf_norm = np.linalg.norm(P_diff, ord=2, axis=2, keepdims=False)
    rbf = np.multiply(np.square(rbf_norm), np.log(rbf_norm + eps))
    return np.concatenate([np.ones((n, 1)), P, rbf], axis=1)


def _build_buffers(F, output_size, eps, k_pad):
    """Host precompute.

    A^T = ((P_hat @ inv_delta_C)[:, :F])^T, zero-padded along the contraction
    axis from F to k_pad (exact: the padded rows only ever multiply the
    zero-padded columns of X_t).  Also returns the f32 buffers for the
    pure-JAX reference (original two-matmul formulation).
    """
    H, W = output_size
    C = _build_C(F)
    inv_delta_C = _build_inv_delta_C(F, C)                  # (F+3, F+3) float64
    P = _build_P(W, H)
    P_hat = _build_P_hat(F, C, P, eps)                      # (n, F+3)   float64
    A = (P_hat @ inv_delta_C)[:, :F]                        # (n, F)     float64
    A_T = A.T.astype(np.float32)                            # (F, n)
    A_T_pad = np.zeros((k_pad, A_T.shape[1]), np.float32)
    A_T_pad[:F] = A_T                                       # (k_pad, n)
    return A_T_pad, inv_delta_C.astype(np.float32), P_hat.astype(np.float32)


# ----------------------------------------------------------------------------
# Pallas kernel: one lane-dense MXU matmul for the whole batch
# ----------------------------------------------------------------------------
def _grid_gen_kernel(xt_ref, a_t_ref, out_ref):
    # xt_ref  : (M_pad, K_pad)  -- x with (batch, coord) stacked on sublanes,
    #                              zero-padded to full f32 sublane tiles
    # a_t_ref : (K_pad, n)      -- precomputed ((P_hat @ inv_delta_C)[:, :F])^T
    # out_ref : (M_pad, n)      -- lane-dense output (n = H*W, multiple of 128)
    out_ref[...] = jnp.dot(xt_ref[...], a_t_ref[...],
                           preferred_element_type=jnp.float32)


@functools.partial(jax.jit, static_argnames=("output_size",))
def grid_generator_forward(x, A_T_pad, output_size):
    """x: (B, F, 2) f32, A_T_pad: (K_pad, H*W) f32 -> (B, H, W, 2) f32."""
    B, F_, two = x.shape
    assert two == 2
    H, W = output_size
    n = H * W
    K_pad = A_T_pad.shape[0]
    assert A_T_pad.shape == (K_pad, n) and K_pad >= F_

    M = 2 * B
    M_pad = max(8, ((M + 7) // 8) * 8)   # f32 sublane tile

    # Layout plumbing (fused into the pallas_call operand via
    # allow_input_fusion): X_t[b*2 + c, f] = x[b, f, c], zero-padded.
    x_t = jnp.transpose(x.astype(jnp.float32), (0, 2, 1)).reshape(M, F_)
    x_t = jnp.pad(x_t, ((0, M_pad - M), (0, K_pad - F_)))

    out_t = pl.pallas_call(
        _grid_gen_kernel,
        out_shape=jax.ShapeDtypeStruct((M_pad, n), jnp.float32),
        # No grid: single invocation, whole operands resident in VMEM -> no
        # per-step pipeline overhead, no double-buffering of operands.
        in_specs=[
            pl.BlockSpec(memory_space=pltpu.MemorySpace.VMEM),   # X_t
            pl.BlockSpec(memory_space=pltpu.MemorySpace.VMEM),   # A^T
        ],
        out_specs=pl.BlockSpec(memory_space=pltpu.MemorySpace.VMEM),
        compiler_params=pltpu.CompilerParams(
            # Let XLA fuse the tiny transpose/reshape/pad of x into the
            # custom-call operand (A^T is a plain constant -> no fusion).
            allow_input_fusion=[True, False],
        ),
        cost_estimate=pl.CostEstimate(
            flops=2 * M_pad * K_pad * n,
            transcendentals=0,
            bytes_accessed=(M_pad * K_pad + K_pad * n + M_pad * n) * 4,
        ),
    )(x_t, A_T_pad)

    # out_t[b*2 + c, p] == P_prime[b, p, c]; undo the transpose cheaply.
    out_t = out_t[:M]
    return jnp.transpose(out_t.reshape(B, 2, H, W), (0, 2, 3, 1))


# ----------------------------------------------------------------------------
# Pure-JAX reference (original two-matmul formulation, for correctness check)
# ----------------------------------------------------------------------------
def grid_generator_reference(x, inv_delta_C, P_hat, output_size):
    B, F_, _ = x.shape
    H, W = output_size
    c_prime = jnp.concatenate(
        [x.astype(jnp.float32), jnp.zeros((B, 3, 2), jnp.float32)], axis=1)
    T = jnp.einsum("ij,bjk->bik", inv_delta_C, c_prime)
    P_prime = jnp.einsum("nj,bjk->bnk", P_hat, T)
    return P_prime.reshape(B, H, W, 2)


if __name__ == "__main__":
    # Module hyperparameters (small, consistent with RARE's GridGenerator).
    F_fiducial = 20
    output_size = (16, 16)   # (H, W); n = 256 -> lane-dense output
    eps = 1e-6
    batch = 2
    K_pad = ((F_fiducial + 7) // 8) * 8   # 20 -> 24, contraction-axis align

    # Deterministic parameter/buffer setup (numpy, as in __init__).
    A_T_pad_np, inv_delta_C_np, P_hat_np = _build_buffers(
        F_fiducial, output_size, eps, K_pad)
    A_T_pad = jnp.asarray(A_T_pad_np)
    inv_delta_C = jnp.asarray(inv_delta_C_np)
    P_hat = jnp.asarray(P_hat_np)

    # Deterministic input: batch of predicted fiducial points C' in [-1, 1].
    key = jax.random.PRNGKey(0)
    x = jax.random.uniform(key, (batch, F_fiducial, 2),
                           dtype=jnp.float32, minval=-1.0, maxval=1.0)

    out = grid_generator_forward(x, A_T_pad, output_size)
    out = jax.block_until_ready(out)

    ref = grid_generator_reference(x, inv_delta_C, P_hat, output_size)
    ref = jax.block_until_ready(ref)

    assert out.shape == (batch, output_size[0], output_size[1], 2)
    # Tolerance accounts for f32 accumulation-order / reassociation (the
    # folded A = P_hat @ inv_delta_C is computed in float64 on the host; the
    # f32 two-matmul reference differs only by ~1e-5-level rounding).
    np.testing.assert_allclose(np.asarray(out), np.asarray(ref),
                               rtol=1e-3, atol=2e-4)
    print("KERNEL_OK")
</pallas_src>

<mosaic_0001>
module attributes {stable_mosaic.version = 11 : i64} {
  func.func @_grid_gen_kernel(%arg0: memref<8x24xf32, #tpu.memory_space<vmem>>, %arg1: memref<24x256xf32, #tpu.memory_space<vmem>>, %arg2: memref<8x256xf32, #tpu.memory_space<vmem>>) attributes {dimension_semantics = [], scalar_prefetch = 0 : i64, scratch_operands = 0 : i64, tpu.core_type = #tpu.core_type<tc>} {
    %c0 = arith.constant 0 : index
    %c0_0 = arith.constant 0 : index
    %0 = vector.load %arg0[%c0, %c0_0] : memref<8x24xf32, #tpu.memory_space<vmem>>, vector<8x24xf32>
    %c0_1 = arith.constant 0 : index
    %c0_2 = arith.constant 0 : index
    %1 = vector.load %arg1[%c0_1, %c0_2] : memref<24x256xf32, #tpu.memory_space<vmem>>, vector<24x256xf32>
    %cst = arith.constant dense<0.000000e+00> : vector<8x256xf32>
    %2 = tpu.matmul %0, %1, %cst {dimension_numbers = #tpu.dot_dimension_numbers<[1], [0], [0], [1], [0, 0, 1, 1], [], []>} : vector<8x24xf32>, vector<24x256xf32>, vector<8x256xf32> -> vector<8x256xf32>
    %c0_3 = arith.constant 0 : index
    %c0_4 = arith.constant 0 : index
    %3 = vector.load %arg2[%c0_3, %c0_4] : memref<8x256xf32, #tpu.memory_space<vmem>>, vector<8x256xf32>
    tpu.vector_store %arg2[%c0_3, %c0_4], %2 {strides = array<i32>} : memref<8x256xf32, #tpu.memory_space<vmem>>, vector<8x256xf32>,
    return
  }
}

</mosaic_0001>

<bundles_post_ra>
// kernel: grid_generator_forward.2
= control target key start
LH: loop header
LB: loop body
LE: loop exit
PB: predicated region body
PF: predicated region fallthrough
CT: control target
= control target key end

     0   :  { %s265_s0 = inlined_call_operand.hbm [shape: f32[24,256], index: 0, kind: input, shape index: {}]   ;;  %s266_s1 = inlined_call_operand.hbm [shape: f32[4,20], index: 1, kind: input, shape index: {}]   ;;  %s267_s2 = inlined_call_operand.<no memory space> [shape: f32[], index: 2, kind: input, shape index: {}]   ;;  %s268_s3 = inlined_call_operand.vmem [shape: f32[8,256], index: 3, kind: output, shape index: {}]  }
   0x1   :  { %v8_v0 = vstv %s267_s2 }
   0x2   :  { %9 = vsyncpa [#allocation8], 0 }
   0x3   :  { %10 = vsyncpa [#allocation10], 0  ;;  %s200_s14 = smov [#allocation7]   ;;  %s201_s16 = smov [#allocation9]  }
   0x4   :  { %s17_s15 = sshll.u32 %s200_s14, 4  ;;  %s26_s17 = sshll.u32 %s201_s16, 4  ;;  %s18_s15 = int_to_ptr.vmem [resolvable:$true] %s17_s15  ;;  %s228_s17 = int_to_ptr.vmem [resolvable:$true] %s26_s17 }
   0x5   :  { %s152_s20 = scalar_lea.hbm %s266_s1, 64 }
   0x6   :  { %p153_p0 = scmp.ne.s32.totalorder %s266_s1, %s152_s20  ;;  %p156_p1 = scmp.lt.u32.totalorder %s152_s20, %s266_s1 }
   0x8   :  { %p158_p2 = pnand %p156_p1, %p153_p0 }
   0xa   :  { %161 = shalt.err (!%p158_p2)
}
   0xb   :  { %s162_s2 = scalar_lea.vmem %s18_s15, 64  ;;  %p167_p4 = scmp.lt.s32.totalorder %s18_s15, %s18_s15 }
   0xc   :  { %p163_p3 = scmp.ne.s32.totalorder %s18_s15, %s162_s2  ;;  %p168_p5 = scmp.lt.s32.totalorder %s162_s2, %s162_s2 }
   0xe   :  { %p169_p6 = por %p168_p5, %p167_p4 }
  0x10   :  { %p170_p7 = pnand %p169_p6, %p163_p3 }
  0x12   :  { %173 = shalt.err (!%p170_p7)
}
  0x13   :  { %20 = dma.hbm_to_vmem [thread:$0]  %s266_s1, 64, %s18_s15, [#allocation8]  }
  0x14   :  { %s174_s29 = scalar_lea.hbm %s265_s0, 768 }
  0x15   :  { %p175_p8 = scmp.ne.s32.totalorder %s265_s0, %s174_s29  ;;  %p178_p9 = scmp.lt.u32.totalorder %s174_s29, %s265_s0 }
  0x17   :  { %p180_p10 = pnand %p178_p9, %p175_p8 }
  0x19   :  { %183 = shalt.err (!%p180_p10)
}
  0x1a   :  { %s184_s7 = scalar_lea.vmem %s228_s17, 768  ;;  %p189_p12 = scmp.lt.s32.totalorder %s228_s17, %s228_s17 }
  0x1b   :  { %p185_p11 = scmp.ne.s32.totalorder %s228_s17, %s184_s7  ;;  %p190_p13 = scmp.lt.s32.totalorder %s184_s7, %s184_s7 }
  0x1d   :  { %p191_p0 = por %p190_p13, %p189_p12 }
  0x1f   :  { %p192_p1 = pnand %p191_p0, %p185_p11 }
  0x21   :  { %195 = shalt.err (!%p192_p1)
}
  0x22   :  { %s202_s1 = smov 256   ;;  %s203_s8 = smov 16  }
  0x23   :  { %32 = dma.hbm_to_vmem [thread:$0]  %s265_s0, 768, %s228_s17, [#allocation10], %s202_s1, %s202_s1, %s203_s8  }
  0x24   :  { %196 = dma.done.wait [#allocation8], 64  }
  0x25   :  { %197 = vsyncadd [#allocation8], 4294967232 }
  0x26   :  { %198 = dma.done.wait [#allocation10], 768  }
  0x27   :  { %199 = vsyncadd [#allocation10], 4294966528  ;;  %v40_v1 = vlaneseq  ;;  %v204_v2 = vmov 0.0   ;;  %v54_v5 = vld [vmem:[#allocation9 + $0x8] sm:$0xff]  ;;  %v56_v6 = vld [vmem:[#allocation9 + $0x18] sm:$0xff]  ;;  %vm59_vm2 = vcmask 195584  }
  0x28   :  { %127 = vmatprep.mubr.f32.mxu0 %v204_v2  ;;  %v53_v7 = vld [vmem:[#allocation9] sm:$0xff]  ;;  %v143_v8 = vpack.c.bf16 %v56_v6, %v54_v5  ;;  %v55_v9 = vld [vmem:[#allocation9 + $0x10] sm:$0xff]  ;;  %v58_v11 = vld [vmem:[#allocation9 + $0x28] sm:$0xff] }
  0x29   :  { %v41_v3 = vshrl.u32 %v40_v1, 7  ;;  %v46_v4 = vand.u32 127, %v40_v1  ;;  %v145_v10 = vpack.c.bf16 %v55_v9, %v53_v7  ;;  %v39_v12 = vld [vmem:[#allocation7] sm:$0xf]  ;;  %v57_v14 = vld [vmem:[#allocation9 + $0x20] sm:$0xff] }
  0x2a   :  { %144 = vmatprep.subr.bf16.mxu0 %v143_v8 }
  0x2b   :  { %vm43_vm0 = vcmp.lt.s32.totalorder %v41_v3, 4  ;;  %vm48_vm1 = vcmp.lt.s32.totalorder %v46_v4, 20  ;;  %146 = vmatpush1.bf16.msra.mxu0 %v145_v10 }
  0x2c   :  { %v44_v13 = vsel %vm43_vm0, %v39_v12, %v8_v0  ;;  %67 = vmatprep.subr.mxu0 %v58_v11 }
  0x2d   :  { %v49_v15 = vsel %vm48_vm1, %v44_v13, %v8_v0 }
  0x2f   :  { %68 = vmatpush1.msra.mxu0 %v57_v14 }
  0x30   :  { %142 = vmatmul.mubr.msk.f32.vlgmr.msra.gmra.mrb[0].mxu0 %vm59_vm2, %v49_v15 }
 0x103   :  { %v129_v16 = vpop.f32.mrb[0].mxu0 }
 0x104   :  { %134 = vst [vmem:[%s268_s3] sm:$0xff] %v129_v16  ;;  %v131_v17 = vpop.f32.mrb[1].mxu0 }
 0x105   :  { %135 = vst [vmem:[%s268_s3 + $0x8] sm:$0xff] %v131_v17 }
 0x106   :  { %140 = vsyncpa [#allocation8], 1 }
 0x107   :  { %141 = vsyncpa [#allocation10], 1 }

</bundles_post_ra>
